<compile_context>
chip_gen: v7x
topology: tpu7x:2x2x1
jax: 0.10.0
libtpu: 0.0.40
codegen_flags: <defaults>
</compile_context>

<pallas_src>
import functools

import jax
import jax.numpy as jnp
from jax.experimental import pallas as pl
from jax.experimental.pallas import tpu as pltpu


def _layernorm(t, gamma, beta, eps=1e-5):
    mu = jnp.mean(t, axis=-1, keepdims=True)
    xc = t - mu
    var = jnp.mean(xc * xc, axis=-1, keepdims=True)
    return xc * jax.lax.rsqrt(var + eps) * gamma + beta


def _block_kernel(B, S, NH, HS,
                  x_ref, wqkv_ref, bqkv_ref, wp_ref, bp_ref,
                  w1_ref, b1_ref, w2_ref, b2_ref,
                  g1_ref, be1_ref, g2_ref, be2_ref, o_ref):
    x = x_ref[...]                                # (B*S, F), f32, token-major
    F = x.shape[-1]
    scale = F ** -0.5                             # hidden-size scale, as in reference

    # ---- LayerNorm 1 ----
    x_ln = _layernorm(x, g1_ref[...], be1_ref[...])

    # ---- fused QKV projection for all heads: one (B*S, F) @ (F, 3F) matmul ----
    qkv = jnp.dot(x_ln, wqkv_ref[...], preferred_element_type=jnp.float32) + bqkv_ref[...]
    q = qkv[:, 0 * F:1 * F] * scale               # pre-scale q, not the (S,S) scores
    k = qkv[:, 1 * F:2 * F]
    v = qkv[:, 2 * F:3 * F]

    # ---- attention, statically unrolled over the tiny (batch, head) pairs ----
    # rows [b*S, (b+1)*S) belong to batch b; columns [h*HS, (h+1)*HS) to head h.
    batch_outs = []
    for b in range(B):
        r0 = b * S
        head_outs = []
        for h in range(NH):
            c0 = h * HS
            qh = q[r0:r0 + S, c0:c0 + HS]         # (S, HS)
            kh = k[r0:r0 + S, c0:c0 + HS]
            vh = v[r0:r0 + S, c0:c0 + HS]
            # contract last axes of q and k directly (no kh.T / XLU transpose)
            s = jax.lax.dot_general(
                qh, kh, (((1,), (1,)), ((), ())),
                preferred_element_type=jnp.float32)           # (S, S)
            # NOTE: no causal mask -- reference discards masked_fill's result.
            m = jnp.max(s, axis=-1, keepdims=True)
            e = jnp.exp(s - m)
            w = e / jnp.sum(e, axis=-1, keepdims=True)
            head_outs.append(jnp.dot(w, vh, preferred_element_type=jnp.float32))
        batch_outs.append(jnp.concatenate(head_outs, axis=-1))   # (S, F)
    attn = jnp.concatenate(batch_outs, axis=0)                    # (B*S, F)

    # ---- output projection + residual ----
    sa = jnp.dot(attn, wp_ref[...], preferred_element_type=jnp.float32) + bp_ref[...]
    x1 = sa + x

    # ---- LayerNorm 2 + MLP + residual ----
    x1_ln = _layernorm(x1, g2_ref[...], be2_ref[...])
    h1 = jnp.dot(x1_ln, w1_ref[...], preferred_element_type=jnp.float32) + b1_ref[...]
    h1 = jnp.maximum(h1, 0.0)
    ff = jnp.dot(h1, w2_ref[...], preferred_element_type=jnp.float32) + b2_ref[...]
    out = ff + x1                                                  # (B*S, F)

    # ---- lane-dense store: pad last dim up to the 128-multiple output width ----
    pad = o_ref.shape[-1] - out.shape[-1]
    if pad > 0:
        out = jnp.concatenate(
            [out, jnp.zeros((out.shape[0], pad), out.dtype)], axis=-1)
    o_ref[...] = out.astype(o_ref.dtype)


def block_forward(x, head_params, wp, bp, w1, b1, w2, b2,
                  ln1_g, ln1_b, ln2_g, ln2_b):
    """x: (S, B, F) time-major f32.
    head_params: list of (wq, bq, wk, bk, wv, bv), w*: (HS, F) PyTorch-Linear layout.
    wp: (F, F), w1: (4F, F), w2: (F, 4F); biases / LN params are 1-D of their out dim.
    Returns (S, B, F)."""
    S, B, F = x.shape
    NH = len(head_params)
    HS = F // NH

    # glue: fuse per-head Q/K/V weights -> one (F, 3F) matrix + (1, 3F) bias
    wq = jnp.concatenate([hp[0] for hp in head_params], axis=0)   # (F, F)
    bq = jnp.concatenate([hp[1] for hp in head_params], axis=0)   # (F,)
    wk = jnp.concatenate([hp[2] for hp in head_params], axis=0)
    bk = jnp.concatenate([hp[3] for hp in head_params], axis=0)
    wv = jnp.concatenate([hp[4] for hp in head_params], axis=0)
    bv = jnp.concatenate([hp[5] for hp in head_params], axis=0)
    w_qkv = jnp.concatenate([wq.T, wk.T, wv.T], axis=1)           # (F, 3F)
    b_qkv = jnp.concatenate([bq, bk, bv])[None, :]                # (1, 3F)

    # token-major layout: batch b occupies contiguous rows [b*S, (b+1)*S)
    x_tok = jnp.transpose(x, (1, 0, 2)).reshape(B * S, F)

    F_pad = ((F + 127) // 128) * 128   # lane-dense output width

    kernel = functools.partial(_block_kernel, B, S, NH, HS)
    vmem = pl.BlockSpec(memory_space=pltpu.MemorySpace.VMEM)

    out2d = pl.pallas_call(
        kernel,
        out_shape=jax.ShapeDtypeStruct((B * S, F_pad), x.dtype),
        in_specs=[vmem] * 13,
        out_specs=vmem,
    )(x_tok, w_qkv, b_qkv, wp.T, bp[None, :],
      w1.T, b1[None, :], w2.T, b2[None, :],
      ln1_g[None, :], ln1_b[None, :], ln2_g[None, :], ln2_b[None, :])

    out = out2d[:, :F].reshape(B, S, F)
    return jnp.transpose(out, (1, 0, 2))          # back to (S, B, F)


def _reference(x, head_params, wp, bp, w1, b1, w2, b2,
               ln1_g, ln1_b, ln2_g, ln2_b):
    """Pure-JAX reference mirroring the PyTorch Block forward exactly."""
    def ln(t, g, b, eps=1e-5):
        mu = jnp.mean(t, axis=-1, keepdims=True)
        var = jnp.mean((t - mu) ** 2, axis=-1, keepdims=True)
        return (t - mu) / jnp.sqrt(var + eps) * g + b

    h = ln(x, ln1_g, ln1_b)                       # (S, B, F)
    hb = jnp.transpose(h, (1, 0, 2))              # (B, S, F)
    F = hb.shape[-1]
    outs = []
    for (wq, bq, wk, bk, wv, bv) in head_params:
        q = hb @ wq.T + bq
        k = hb @ wk.T + bk
        v = hb @ wv.T + bv
        w = (q @ jnp.swapaxes(k, -1, -2)) * (F ** -0.5)
        # masked_fill result is discarded in the reference -> no causal mask
        w = jax.nn.softmax(w, axis=-1)
        outs.append(jnp.transpose(w @ v, (1, 0, 2)))   # (S, B, HS)
    cat = jnp.concatenate(outs, axis=-1)               # (S, B, F)
    sa = cat @ wp.T + bp
    x1 = sa + x
    h2 = ln(x1, ln2_g, ln2_b)
    ff = jnp.maximum(h2 @ w1.T + b1, 0.0) @ w2.T + b2
    return ff + x1


if __name__ == "__main__":
    # small shapes: seq=8, batch=2, hidden=32, heads=4 (head_size=8)
    S, B, F, NH = 8, 2, 32, 4

    keys = jax.random.split(jax.random.PRNGKey(0), 40)
    ki = iter(range(40))

    def lin(out_dim, in_dim):
        bound = 1.0 / (in_dim ** 0.5)
        w = jax.random.uniform(keys[next(ki)], (out_dim, in_dim),
                               minval=-bound, maxval=bound, dtype=jnp.float32)
        b = jax.random.uniform(keys[next(ki)], (out_dim,),
                               minval=-bound, maxval=bound, dtype=jnp.float32)
        return w, b

    x = jax.random.normal(keys[next(ki)], (S, B, F), dtype=jnp.float32)

    head_params = []
    for _ in range(NH):
        wq, bq = lin(F // NH, F)
        wk, bk = lin(F // NH, F)
        wv, bv = lin(F // NH, F)
        head_params.append((wq, bq, wk, bk, wv, bv))
    wp, bp = lin(F, F)
    w1, b1 = lin(4 * F, F)
    w2, b2 = lin(F, 4 * F)
    ln1_g = 1.0 + 0.1 * jax.random.normal(keys[next(ki)], (F,), dtype=jnp.float32)
    ln1_b = 0.1 * jax.random.normal(keys[next(ki)], (F,), dtype=jnp.float32)
    ln2_g = 1.0 + 0.1 * jax.random.normal(keys[next(ki)], (F,), dtype=jnp.float32)
    ln2_b = 0.1 * jax.random.normal(keys[next(ki)], (F,), dtype=jnp.float32)

    out = block_forward(x, head_params, wp, bp, w1, b1, w2, b2,
                        ln1_g, ln1_b, ln2_g, ln2_b)
    out = jax.block_until_ready(out)

    ref = _reference(x, head_params, wp, bp, w1, b1, w2, b2,
                     ln1_g, ln1_b, ln2_g, ln2_b)
    assert out.shape == (S, B, F), out.shape
    err = jnp.max(jnp.abs(out - ref))
    assert jnp.allclose(out, ref, atol=5e-5, rtol=5e-5), f"mismatch vs reference (max abs err {err})"

    print("KERNEL_OK")
</pallas_src>

<mosaic_0001>
module attributes {stable_mosaic.version = 11 : i64} {
  func.func @_block_kernel(%arg0: memref<16x32xf32, #tpu.memory_space<vmem>>, %arg1: memref<32x96xf32, #tpu.memory_space<vmem>>, %arg2: memref<1x96xf32, #tpu.memory_space<vmem>>, %arg3: memref<32x32xf32, #tpu.memory_space<vmem>>, %arg4: memref<1x32xf32, #tpu.memory_space<vmem>>, %arg5: memref<32x128xf32, #tpu.memory_space<vmem>>, %arg6: memref<1x128xf32, #tpu.memory_space<vmem>>, %arg7: memref<128x32xf32, #tpu.memory_space<vmem>>, %arg8: memref<1x32xf32, #tpu.memory_space<vmem>>, %arg9: memref<1x32xf32, #tpu.memory_space<vmem>>, %arg10: memref<1x32xf32, #tpu.memory_space<vmem>>, %arg11: memref<1x32xf32, #tpu.memory_space<vmem>>, %arg12: memref<1x32xf32, #tpu.memory_space<vmem>>, %arg13: memref<16x128xf32, #tpu.memory_space<vmem>>) attributes {dimension_semantics = [], scalar_prefetch = 0 : i64, scratch_operands = 0 : i64, tpu.core_type = #tpu.core_type<tc>} {
    %c0 = arith.constant 0 : index
    %c0_0 = arith.constant 0 : index
    %0 = vector.load %arg0[%c0, %c0_0] : memref<16x32xf32, #tpu.memory_space<vmem>>, vector<16x32xf32>
    %c0_1 = arith.constant 0 : index
    %c0_2 = arith.constant 0 : index
    %1 = vector.load %arg9[%c0_1, %c0_2] : memref<1x32xf32, #tpu.memory_space<vmem>>, vector<1x32xf32>
    %c0_3 = arith.constant 0 : index
    %c0_4 = arith.constant 0 : index
    %2 = vector.load %arg10[%c0_3, %c0_4] : memref<1x32xf32, #tpu.memory_space<vmem>>, vector<1x32xf32>
    %cst = arith.constant dense<0.000000e+00> : vector<16xf32>
    %3 = vector.multi_reduction <add>, %0, %cst [1] : vector<16x32xf32> to vector<16xf32>
    %4 = vector.shape_cast %3 : vector<16xf32> to vector<16x1xf32>
    %cst_5 = arith.constant 3.200000e+01 : f32
    %5 = vector.broadcast %cst_5 : f32 to vector<16x1xf32>
    %6 = arith.divf %4, %5 : vector<16x1xf32>
    %7 = vector.broadcast %6 : vector<16x1xf32> to vector<16x32xf32>
    %8 = arith.subf %0, %7 : vector<16x32xf32>
    %9 = arith.mulf %8, %8 : vector<16x32xf32>
    %cst_6 = arith.constant dense<0.000000e+00> : vector<16xf32>
    %10 = vector.multi_reduction <add>, %9, %cst_6 [1] : vector<16x32xf32> to vector<16xf32>
    %11 = vector.shape_cast %10 : vector<16xf32> to vector<16x1xf32>
    %cst_7 = arith.constant 3.200000e+01 : f32
    %12 = vector.broadcast %cst_7 : f32 to vector<16x1xf32>
    %13 = arith.divf %11, %12 : vector<16x1xf32>
    %cst_8 = arith.constant 9.99999974E-6 : f32
    %14 = vector.broadcast %cst_8 : f32 to vector<16x1xf32>
    %15 = arith.addf %13, %14 : vector<16x1xf32>
    %16 = math.rsqrt %15 : vector<16x1xf32>
    %17 = vector.broadcast %16 : vector<16x1xf32> to vector<16x32xf32>
    %18 = arith.mulf %8, %17 : vector<16x32xf32>
    %19 = vector.broadcast %1 : vector<1x32xf32> to vector<16x32xf32>
    %20 = arith.mulf %18, %19 : vector<16x32xf32>
    %21 = vector.broadcast %2 : vector<1x32xf32> to vector<16x32xf32>
    %22 = arith.addf %20, %21 : vector<16x32xf32>
    %c0_9 = arith.constant 0 : index
    %c0_10 = arith.constant 0 : index
    %23 = vector.load %arg1[%c0_9, %c0_10] : memref<32x96xf32, #tpu.memory_space<vmem>>, vector<32x96xf32>
    %cst_11 = arith.constant dense<0.000000e+00> : vector<16x96xf32>
    %24 = tpu.matmul %22, %23, %cst_11 {dimension_numbers = #tpu.dot_dimension_numbers<[1], [0], [0], [1], [0, 0, 1, 1], [], []>} : vector<16x32xf32>, vector<32x96xf32>, vector<16x96xf32> -> vector<16x96xf32>
    %c0_12 = arith.constant 0 : index
    %c0_13 = arith.constant 0 : index
    %25 = vector.load %arg2[%c0_12, %c0_13] : memref<1x96xf32, #tpu.memory_space<vmem>>, vector<1x96xf32>
    %26 = vector.broadcast %25 : vector<1x96xf32> to vector<16x96xf32>
    %27 = arith.addf %24, %26 : vector<16x96xf32>
    %28 = vector.extract_strided_slice %27 {offsets = [0, 0], sizes = [16, 32], strides = [1, 1]} : vector<16x96xf32> to vector<16x32xf32>
    %cst_14 = arith.constant 0.176776692 : f32
    %29 = vector.broadcast %cst_14 : f32 to vector<16x32xf32>
    %30 = arith.mulf %28, %29 : vector<16x32xf32>
    %31 = vector.extract_strided_slice %27 {offsets = [0, 32], sizes = [16, 32], strides = [1, 1]} : vector<16x96xf32> to vector<16x32xf32>
    %32 = vector.extract_strided_slice %27 {offsets = [0, 64], sizes = [16, 32], strides = [1, 1]} : vector<16x96xf32> to vector<16x32xf32>
    %33 = vector.extract_strided_slice %30 {offsets = [0, 0], sizes = [8, 8], strides = [1, 1]} : vector<16x32xf32> to vector<8x8xf32>
    %34 = vector.extract_strided_slice %31 {offsets = [0, 0], sizes = [8, 8], strides = [1, 1]} : vector<16x32xf32> to vector<8x8xf32>
    %35 = vector.extract_strided_slice %32 {offsets = [0, 0], sizes = [8, 8], strides = [1, 1]} : vector<16x32xf32> to vector<8x8xf32>
    %cst_15 = arith.constant dense<0.000000e+00> : vector<8x8xf32>
    %36 = tpu.matmul %33, %34, %cst_15 {dimension_numbers = #tpu.dot_dimension_numbers<[1], [1], [0], [0], [0, 0, 1, 0], [], []>} : vector<8x8xf32>, vector<8x8xf32>, vector<8x8xf32> -> vector<8x8xf32>
    %cst_16 = arith.constant dense<0xFF800000> : vector<8xf32>
    %37 = vector.multi_reduction <maximumf>, %36, %cst_16 [1] : vector<8x8xf32> to vector<8xf32>
    %38 = vector.shape_cast %37 : vector<8xf32> to vector<8x1xf32>
    %39 = vector.broadcast %38 : vector<8x1xf32> to vector<8x8xf32>
    %40 = arith.subf %36, %39 : vector<8x8xf32>
    %41 = math.exp %40 : vector<8x8xf32>
    %cst_17 = arith.constant dense<0.000000e+00> : vector<8xf32>
    %42 = vector.multi_reduction <add>, %41, %cst_17 [1] : vector<8x8xf32> to vector<8xf32>
    %43 = vector.shape_cast %42 : vector<8xf32> to vector<8x1xf32>
    %44 = vector.broadcast %43 : vector<8x1xf32> to vector<8x8xf32>
    %45 = arith.divf %41, %44 : vector<8x8xf32>
    %cst_18 = arith.constant dense<0.000000e+00> : vector<8x8xf32>
    %46 = tpu.matmul %45, %35, %cst_18 {dimension_numbers = #tpu.dot_dimension_numbers<[1], [0], [0], [1], [0, 0, 1, 1], [], []>} : vector<8x8xf32>, vector<8x8xf32>, vector<8x8xf32> -> vector<8x8xf32>
    %47 = vector.extract_strided_slice %30 {offsets = [0, 8], sizes = [8, 8], strides = [1, 1]} : vector<16x32xf32> to vector<8x8xf32>
    %48 = vector.extract_strided_slice %31 {offsets = [0, 8], sizes = [8, 8], strides = [1, 1]} : vector<16x32xf32> to vector<8x8xf32>
    %49 = vector.extract_strided_slice %32 {offsets = [0, 8], sizes = [8, 8], strides = [1, 1]} : vector<16x32xf32> to vector<8x8xf32>
    %cst_19 = arith.constant dense<0.000000e+00> : vector<8x8xf32>
    %50 = tpu.matmul %47, %48, %cst_19 {dimension_numbers = #tpu.dot_dimension_numbers<[1], [1], [0], [0], [0, 0, 1, 0], [], []>} : vector<8x8xf32>, vector<8x8xf32>, vector<8x8xf32> -> vector<8x8xf32>
    %cst_20 = arith.constant dense<0xFF800000> : vector<8xf32>
    %51 = vector.multi_reduction <maximumf>, %50, %cst_20 [1] : vector<8x8xf32> to vector<8xf32>
    %52 = vector.shape_cast %51 : vector<8xf32> to vector<8x1xf32>
    %53 = vector.broadcast %52 : vector<8x1xf32> to vector<8x8xf32>
    %54 = arith.subf %50, %53 : vector<8x8xf32>
    %55 = math.exp %54 : vector<8x8xf32>
    %cst_21 = arith.constant dense<0.000000e+00> : vector<8xf32>
    %56 = vector.multi_reduction <add>, %55, %cst_21 [1] : vector<8x8xf32> to vector<8xf32>
    %57 = vector.shape_cast %56 : vector<8xf32> to vector<8x1xf32>
    %58 = vector.broadcast %57 : vector<8x1xf32> to vector<8x8xf32>
    %59 = arith.divf %55, %58 : vector<8x8xf32>
    %cst_22 = arith.constant dense<0.000000e+00> : vector<8x8xf32>
    %60 = tpu.matmul %59, %49, %cst_22 {dimension_numbers = #tpu.dot_dimension_numbers<[1], [0], [0], [1], [0, 0, 1, 1], [], []>} : vector<8x8xf32>, vector<8x8xf32>, vector<8x8xf32> -> vector<8x8xf32>
    %61 = vector.extract_strided_slice %30 {offsets = [0, 16], sizes = [8, 8], strides = [1, 1]} : vector<16x32xf32> to vector<8x8xf32>
    %62 = vector.extract_strided_slice %31 {offsets = [0, 16], sizes = [8, 8], strides = [1, 1]} : vector<16x32xf32> to vector<8x8xf32>
    %63 = vector.extract_strided_slice %32 {offsets = [0, 16], sizes = [8, 8], strides = [1, 1]} : vector<16x32xf32> to vector<8x8xf32>
    %cst_23 = arith.constant dense<0.000000e+00> : vector<8x8xf32>
    %64 = tpu.matmul %61, %62, %cst_23 {dimension_numbers = #tpu.dot_dimension_numbers<[1], [1], [0], [0], [0, 0, 1, 0], [], []>} : vector<8x8xf32>, vector<8x8xf32>, vector<8x8xf32> -> vector<8x8xf32>
    %cst_24 = arith.constant dense<0xFF800000> : vector<8xf32>
    %65 = vector.multi_reduction <maximumf>, %64, %cst_24 [1] : vector<8x8xf32> to vector<8xf32>
    %66 = vector.shape_cast %65 : vector<8xf32> to vector<8x1xf32>
    %67 = vector.broadcast %66 : vector<8x1xf32> to vector<8x8xf32>
    %68 = arith.subf %64, %67 : vector<8x8xf32>
    %69 = math.exp %68 : vector<8x8xf32>
    %cst_25 = arith.constant dense<0.000000e+00> : vector<8xf32>
    %70 = vector.multi_reduction <add>, %69, %cst_25 [1] : vector<8x8xf32> to vector<8xf32>
    %71 = vector.shape_cast %70 : vector<8xf32> to vector<8x1xf32>
    %72 = vector.broadcast %71 : vector<8x1xf32> to vector<8x8xf32>
    %73 = arith.divf %69, %72 : vector<8x8xf32>
    %cst_26 = arith.constant dense<0.000000e+00> : vector<8x8xf32>
    %74 = tpu.matmul %73, %63, %cst_26 {dimension_numbers = #tpu.dot_dimension_numbers<[1], [0], [0], [1], [0, 0, 1, 1], [], []>} : vector<8x8xf32>, vector<8x8xf32>, vector<8x8xf32> -> vector<8x8xf32>
    %75 = vector.extract_strided_slice %30 {offsets = [0, 24], sizes = [8, 8], strides = [1, 1]} : vector<16x32xf32> to vector<8x8xf32>
    %76 = vector.extract_strided_slice %31 {offsets = [0, 24], sizes = [8, 8], strides = [1, 1]} : vector<16x32xf32> to vector<8x8xf32>
    %77 = vector.extract_strided_slice %32 {offsets = [0, 24], sizes = [8, 8], strides = [1, 1]} : vector<16x32xf32> to vector<8x8xf32>
    %cst_27 = arith.constant dense<0.000000e+00> : vector<8x8xf32>
    %78 = tpu.matmul %75, %76, %cst_27 {dimension_numbers = #tpu.dot_dimension_numbers<[1], [1], [0], [0], [0, 0, 1, 0], [], []>} : vector<8x8xf32>, vector<8x8xf32>, vector<8x8xf32> -> vector<8x8xf32>
    %cst_28 = arith.constant dense<0xFF800000> : vector<8xf32>
    %79 = vector.multi_reduction <maximumf>, %78, %cst_28 [1] : vector<8x8xf32> to vector<8xf32>
    %80 = vector.shape_cast %79 : vector<8xf32> to vector<8x1xf32>
    %81 = vector.broadcast %80 : vector<8x1xf32> to vector<8x8xf32>
    %82 = arith.subf %78, %81 : vector<8x8xf32>
    %83 = math.exp %82 : vector<8x8xf32>
    %cst_29 = arith.constant dense<0.000000e+00> : vector<8xf32>
    %84 = vector.multi_reduction <add>, %83, %cst_29 [1] : vector<8x8xf32> to vector<8xf32>
    %85 = vector.shape_cast %84 : vector<8xf32> to vector<8x1xf32>
    %86 = vector.broadcast %85 : vector<8x1xf32> to vector<8x8xf32>
    %87 = arith.divf %83, %86 : vector<8x8xf32>
    %cst_30 = arith.constant dense<0.000000e+00> : vector<8x8xf32>
    %88 = tpu.matmul %87, %77, %cst_30 {dimension_numbers = #tpu.dot_dimension_numbers<[1], [0], [0], [1], [0, 0, 1, 1], [], []>} : vector<8x8xf32>, vector<8x8xf32>, vector<8x8xf32> -> vector<8x8xf32>
    %89 = tpu.concatenate %46, %60, %74, %88 in 1 : vector<8x8xf32>, vector<8x8xf32>, vector<8x8xf32>, vector<8x8xf32> -> vector<8x32xf32>
    %90 = vector.extract_strided_slice %30 {offsets = [8, 0], sizes = [8, 8], strides = [1, 1]} : vector<16x32xf32> to vector<8x8xf32>
    %91 = vector.extract_strided_slice %31 {offsets = [8, 0], sizes = [8, 8], strides = [1, 1]} : vector<16x32xf32> to vector<8x8xf32>
    %92 = vector.extract_strided_slice %32 {offsets = [8, 0], sizes = [8, 8], strides = [1, 1]} : vector<16x32xf32> to vector<8x8xf32>
    %cst_31 = arith.constant dense<0.000000e+00> : vector<8x8xf32>
    %93 = tpu.matmul %90, %91, %cst_31 {dimension_numbers = #tpu.dot_dimension_numbers<[1], [1], [0], [0], [0, 0, 1, 0], [], []>} : vector<8x8xf32>, vector<8x8xf32>, vector<8x8xf32> -> vector<8x8xf32>
    %cst_32 = arith.constant dense<0xFF800000> : vector<8xf32>
    %94 = vector.multi_reduction <maximumf>, %93, %cst_32 [1] : vector<8x8xf32> to vector<8xf32>
    %95 = vector.shape_cast %94 : vector<8xf32> to vector<8x1xf32>
    %96 = vector.broadcast %95 : vector<8x1xf32> to vector<8x8xf32>
    %97 = arith.subf %93, %96 : vector<8x8xf32>
    %98 = math.exp %97 : vector<8x8xf32>
    %cst_33 = arith.constant dense<0.000000e+00> : vector<8xf32>
    %99 = vector.multi_reduction <add>, %98, %cst_33 [1] : vector<8x8xf32> to vector<8xf32>
    %100 = vector.shape_cast %99 : vector<8xf32> to vector<8x1xf32>
    %101 = vector.broadcast %100 : vector<8x1xf32> to vector<8x8xf32>
    %102 = arith.divf %98, %101 : vector<8x8xf32>
    %cst_34 = arith.constant dense<0.000000e+00> : vector<8x8xf32>
    %103 = tpu.matmul %102, %92, %cst_34 {dimension_numbers = #tpu.dot_dimension_numbers<[1], [0], [0], [1], [0, 0, 1, 1], [], []>} : vector<8x8xf32>, vector<8x8xf32>, vector<8x8xf32> -> vector<8x8xf32>
    %104 = vector.extract_strided_slice %30 {offsets = [8, 8], sizes = [8, 8], strides = [1, 1]} : vector<16x32xf32> to vector<8x8xf32>
    %105 = vector.extract_strided_slice %31 {offsets = [8, 8], sizes = [8, 8], strides = [1, 1]} : vector<16x32xf32> to vector<8x8xf32>
    %106 = vector.extract_strided_slice %32 {offsets = [8, 8], sizes = [8, 8], strides = [1, 1]} : vector<16x32xf32> to vector<8x8xf32>
    %cst_35 = arith.constant dense<0.000000e+00> : vector<8x8xf32>
    %107 = tpu.matmul %104, %105, %cst_35 {dimension_numbers = #tpu.dot_dimension_numbers<[1], [1], [0], [0], [0, 0, 1, 0], [], []>} : vector<8x8xf32>, vector<8x8xf32>, vector<8x8xf32> -> vector<8x8xf32>
    %cst_36 = arith.constant dense<0xFF800000> : vector<8xf32>
    %108 = vector.multi_reduction <maximumf>, %107, %cst_36 [1] : vector<8x8xf32> to vector<8xf32>
    %109 = vector.shape_cast %108 : vector<8xf32> to vector<8x1xf32>
    %110 = vector.broadcast %109 : vector<8x1xf32> to vector<8x8xf32>
    %111 = arith.subf %107, %110 : vector<8x8xf32>
    %112 = math.exp %111 : vector<8x8xf32>
    %cst_37 = arith.constant dense<0.000000e+00> : vector<8xf32>
    %113 = vector.multi_reduction <add>, %112, %cst_37 [1] : vector<8x8xf32> to vector<8xf32>
    %114 = vector.shape_cast %113 : vector<8xf32> to vector<8x1xf32>
    %115 = vector.broadcast %114 : vector<8x1xf32> to vector<8x8xf32>
    %116 = arith.divf %112, %115 : vector<8x8xf32>
    %cst_38 = arith.constant dense<0.000000e+00> : vector<8x8xf32>
    %117 = tpu.matmul %116, %106, %cst_38 {dimension_numbers = #tpu.dot_dimension_numbers<[1], [0], [0], [1], [0, 0, 1, 1], [], []>} : vector<8x8xf32>, vector<8x8xf32>, vector<8x8xf32> -> vector<8x8xf32>
    %118 = vector.extract_strided_slice %30 {offsets = [8, 16], sizes = [8, 8], strides = [1, 1]} : vector<16x32xf32> to vector<8x8xf32>
    %119 = vector.extract_strided_slice %31 {offsets = [8, 16], sizes = [8, 8], strides = [1, 1]} : vector<16x32xf32> to vector<8x8xf32>
    %120 = vector.extract_strided_slice %32 {offsets = [8, 16], sizes = [8, 8], strides = [1, 1]} : vector<16x32xf32> to vector<8x8xf32>
    %cst_39 = arith.constant dense<0.000000e+00> : vector<8x8xf32>
    %121 = tpu.matmul %118, %119, %cst_39 {dimension_numbers = #tpu.dot_dimension_numbers<[1], [1], [0], [0], [0, 0, 1, 0], [], []>} : vector<8x8xf32>, vector<8x8xf32>, vector<8x8xf32> -> vector<8x8xf32>
    %cst_40 = arith.constant dense<0xFF800000> : vector<8xf32>
    %122 = vector.multi_reduction <maximumf>, %121, %cst_40 [1] : vector<8x8xf32> to vector<8xf32>
    %123 = vector.shape_cast %122 : vector<8xf32> to vector<8x1xf32>
    %124 = vector.broadcast %123 : vector<8x1xf32> to vector<8x8xf32>
    %125 = arith.subf %121, %124 : vector<8x8xf32>
    %126 = math.exp %125 : vector<8x8xf32>
    %cst_41 = arith.constant dense<0.000000e+00> : vector<8xf32>
    %127 = vector.multi_reduction <add>, %126, %cst_41 [1] : vector<8x8xf32> to vector<8xf32>
    %128 = vector.shape_cast %127 : vector<8xf32> to vector<8x1xf32>
    %129 = vector.broadcast %128 : vector<8x1xf32> to vector<8x8xf32>
    %130 = arith.divf %126, %129 : vector<8x8xf32>
    %cst_42 = arith.constant dense<0.000000e+00> : vector<8x8xf32>
    %131 = tpu.matmul %130, %120, %cst_42 {dimension_numbers = #tpu.dot_dimension_numbers<[1], [0], [0], [1], [0, 0, 1, 1], [], []>} : vector<8x8xf32>, vector<8x8xf32>, vector<8x8xf32> -> vector<8x8xf32>
    %132 = vector.extract_strided_slice %30 {offsets = [8, 24], sizes = [8, 8], strides = [1, 1]} : vector<16x32xf32> to vector<8x8xf32>
    %133 = vector.extract_strided_slice %31 {offsets = [8, 24], sizes = [8, 8], strides = [1, 1]} : vector<16x32xf32> to vector<8x8xf32>
    %134 = vector.extract_strided_slice %32 {offsets = [8, 24], sizes = [8, 8], strides = [1, 1]} : vector<16x32xf32> to vector<8x8xf32>
    %cst_43 = arith.constant dense<0.000000e+00> : vector<8x8xf32>
    %135 = tpu.matmul %132, %133, %cst_43 {dimension_numbers = #tpu.dot_dimension_numbers<[1], [1], [0], [0], [0, 0, 1, 0], [], []>} : vector<8x8xf32>, vector<8x8xf32>, vector<8x8xf32> -> vector<8x8xf32>
    %cst_44 = arith.constant dense<0xFF800000> : vector<8xf32>
    %136 = vector.multi_reduction <maximumf>, %135, %cst_44 [1] : vector<8x8xf32> to vector<8xf32>
    %137 = vector.shape_cast %136 : vector<8xf32> to vector<8x1xf32>
    %138 = vector.broadcast %137 : vector<8x1xf32> to vector<8x8xf32>
    %139 = arith.subf %135, %138 : vector<8x8xf32>
    %140 = math.exp %139 : vector<8x8xf32>
    %cst_45 = arith.constant dense<0.000000e+00> : vector<8xf32>
    %141 = vector.multi_reduction <add>, %140, %cst_45 [1] : vector<8x8xf32> to vector<8xf32>
    %142 = vector.shape_cast %141 : vector<8xf32> to vector<8x1xf32>
    %143 = vector.broadcast %142 : vector<8x1xf32> to vector<8x8xf32>
    %144 = arith.divf %140, %143 : vector<8x8xf32>
    %cst_46 = arith.constant dense<0.000000e+00> : vector<8x8xf32>
    %145 = tpu.matmul %144, %134, %cst_46 {dimension_numbers = #tpu.dot_dimension_numbers<[1], [0], [0], [1], [0, 0, 1, 1], [], []>} : vector<8x8xf32>, vector<8x8xf32>, vector<8x8xf32> -> vector<8x8xf32>
    %146 = tpu.concatenate %103, %117, %131, %145 in 1 : vector<8x8xf32>, vector<8x8xf32>, vector<8x8xf32>, vector<8x8xf32> -> vector<8x32xf32>
    %147 = tpu.concatenate %89, %146 in 0 : vector<8x32xf32>, vector<8x32xf32> -> vector<16x32xf32>
    %c0_47 = arith.constant 0 : index
    %c0_48 = arith.constant 0 : index
    %148 = vector.load %arg3[%c0_47, %c0_48] : memref<32x32xf32, #tpu.memory_space<vmem>>, vector<32x32xf32>
    %cst_49 = arith.constant dense<0.000000e+00> : vector<16x32xf32>
    %149 = tpu.matmul %147, %148, %cst_49 {dimension_numbers = #tpu.dot_dimension_numbers<[1], [0], [0], [1], [0, 0, 1, 1], [], []>} : vector<16x32xf32>, vector<32x32xf32>, vector<16x32xf32> -> vector<16x32xf32>
    %c0_50 = arith.constant 0 : index
    %c0_51 = arith.constant 0 : index
    %150 = vector.load %arg4[%c0_50, %c0_51] : memref<1x32xf32, #tpu.memory_space<vmem>>, vector<1x32xf32>
    %151 = vector.broadcast %150 : vector<1x32xf32> to vector<16x32xf32>
    %152 = arith.addf %149, %151 : vector<16x32xf32>
    %153 = arith.addf %152, %0 : vector<16x32xf32>
    %c0_52 = arith.constant 0 : index
    %c0_53 = arith.constant 0 : index
    %154 = vector.load %arg11[%c0_52, %c0_53] : memref<1x32xf32, #tpu.memory_space<vmem>>, vector<1x32xf32>
    %c0_54 = arith.constant 0 : index
    %c0_55 = arith.constant 0 : index
    %155 = vector.load %arg12[%c0_54, %c0_55] : memref<1x32xf32, #tpu.memory_space<vmem>>, vector<1x32xf32>
    %cst_56 = arith.constant dense<0.000000e+00> : vector<16xf32>
    %156 = vector.multi_reduction <add>, %153, %cst_56 [1] : vector<16x32xf32> to vector<16xf32>
    %157 = vector.shape_cast %156 : vector<16xf32> to vector<16x1xf32>
    %cst_57 = arith.constant 3.200000e+01 : f32
    %158 = vector.broadcast %cst_57 : f32 to vector<16x1xf32>
    %159 = arith.divf %157, %158 : vector<16x1xf32>
    %160 = vector.broadcast %159 : vector<16x1xf32> to vector<16x32xf32>
    %161 = arith.subf %153, %160 : vector<16x32xf32>
    %162 = arith.mulf %161, %161 : vector<16x32xf32>
    %cst_58 = arith.constant dense<0.000000e+00> : vector<16xf32>
    %163 = vector.multi_reduction <add>, %162, %cst_58 [1] : vector<16x32xf32> to vector<16xf32>
    %164 = vector.shape_cast %163 : vector<16xf32> to vector<16x1xf32>
    %cst_59 = arith.constant 3.200000e+01 : f32
    %165 = vector.broadcast %cst_59 : f32 to vector<16x1xf32>
    %166 = arith.divf %164, %165 : vector<16x1xf32>
    %cst_60 = arith.constant 9.99999974E-6 : f32
    %167 = vector.broadcast %cst_60 : f32 to vector<16x1xf32>
    %168 = arith.addf %166, %167 : vector<16x1xf32>
    %169 = math.rsqrt %168 : vector<16x1xf32>
    %170 = vector.broadcast %169 : vector<16x1xf32> to vector<16x32xf32>
    %171 = arith.mulf %161, %170 : vector<16x32xf32>
    %172 = vector.broadcast %154 : vector<1x32xf32> to vector<16x32xf32>
    %173 = arith.mulf %171, %172 : vector<16x32xf32>
    %174 = vector.broadcast %155 : vector<1x32xf32> to vector<16x32xf32>
    %175 = arith.addf %173, %174 : vector<16x32xf32>
    %c0_61 = arith.constant 0 : index
    %c0_62 = arith.constant 0 : index
    %176 = vector.load %arg5[%c0_61, %c0_62] : memref<32x128xf32, #tpu.memory_space<vmem>>, vector<32x128xf32>
    %cst_63 = arith.constant dense<0.000000e+00> : vector<16x128xf32>
    %177 = tpu.matmul %175, %176, %cst_63 {dimension_numbers = #tpu.dot_dimension_numbers<[1], [0], [0], [1], [0, 0, 1, 1], [], []>} : vector<16x32xf32>, vector<32x128xf32>, vector<16x128xf32> -> vector<16x128xf32>
    %c0_64 = arith.constant 0 : index
    %c0_65 = arith.constant 0 : index
    %178 = vector.load %arg6[%c0_64, %c0_65] : memref<1x128xf32, #tpu.memory_space<vmem>>, vector<1x128xf32>
    %179 = vector.broadcast %178 : vector<1x128xf32> to vector<16x128xf32>
    %180 = arith.addf %177, %179 : vector<16x128xf32>
    %cst_66 = arith.constant 0.000000e+00 : f32
    %181 = vector.broadcast %cst_66 : f32 to vector<16x128xf32>
    %182 = arith.maximumf %180, %181 : vector<16x128xf32>
    %c0_67 = arith.constant 0 : index
    %c0_68 = arith.constant 0 : index
    %183 = vector.load %arg7[%c0_67, %c0_68] : memref<128x32xf32, #tpu.memory_space<vmem>>, vector<128x32xf32>
    %cst_69 = arith.constant dense<0.000000e+00> : vector<16x32xf32>
    %184 = tpu.matmul %182, %183, %cst_69 {dimension_numbers = #tpu.dot_dimension_numbers<[1], [0], [0], [1], [0, 0, 1, 1], [], []>} : vector<16x128xf32>, vector<128x32xf32>, vector<16x32xf32> -> vector<16x32xf32>
    %c0_70 = arith.constant 0 : index
    %c0_71 = arith.constant 0 : index
    %185 = vector.load %arg8[%c0_70, %c0_71] : memref<1x32xf32, #tpu.memory_space<vmem>>, vector<1x32xf32>
    %186 = vector.broadcast %185 : vector<1x32xf32> to vector<16x32xf32>
    %187 = arith.addf %184, %186 : vector<16x32xf32>
    %188 = arith.addf %187, %153 : vector<16x32xf32>
    %cst_72 = arith.constant 0.000000e+00 : f32
    %189 = vector.broadcast %cst_72 : f32 to vector<16x96xf32>
    %190 = tpu.concatenate %188, %189 in 1 : vector<16x32xf32>, vector<16x96xf32> -> vector<16x128xf32>
    %c0_73 = arith.constant 0 : index
    %c0_74 = arith.constant 0 : index
    %191 = vector.load %arg13[%c0_73, %c0_74] : memref<16x128xf32, #tpu.memory_space<vmem>>, vector<16x128xf32>
    tpu.vector_store %arg13[%c0_73, %c0_74], %190 {strides = array<i32>} : memref<16x128xf32, #tpu.memory_space<vmem>>, vector<16x128xf32>,
    return
  }
}

</mosaic_0001>

<bundles_post_ra>
// kernel: tpu_custom_call.1
= control target key start
LH: loop header
LB: loop body
LE: loop exit
PB: predicated region body
PF: predicated region fallthrough
CT: control target
= control target key end

     0   :  { %vm49_vm0 = vcmask 261120   ;;  %s2678_s0 = inlined_call_operand.vmem [shape: f32[16,32], index: 0, kind: input, shape index: {}]   ;;  %s2679_s1 = inlined_call_operand.vmem [shape: f32[32,96], index: 1, kind: input, shape index: {}]   ;;  %s2680_s2 = inlined_call_operand.vmem [shape: f32[1,96], index: 2, kind: input, shape index: {}]   ;;  %s2681_s3 = inlined_call_operand.vmem [shape: f32[32,32], index: 3, kind: input, shape index: {}]   ;;  %s2682_s4 = inlined_call_operand.vmem [shape: f32[1,32], index: 4, kind: input, shape index: {}]   ;;  %s2683_s5 = inlined_call_operand.vmem [shape: f32[32,128], index: 5, kind: input, shape index: {}]   ;;  %s2684_s6 = inlined_call_operand.vmem [shape: f32[1,128], index: 6, kind: input, shape index: {}]   ;;  %s2685_s7 = inlined_call_operand.vmem [shape: f32[128,32], index: 7, kind: input, shape index: {}]   ;;  %s2686_s8 = inlined_call_operand.vmem [shape: f32[1,32], index: 8, kind: input, shape index: {}]   ;;  %s2687_s9 = inlined_call_operand.vmem [shape: f32[1,32], index: 9, kind: input, shape index: {}]   ;;  %s2688_s10 = inlined_call_operand.vmem [shape: f32[1,32], index: 10, kind: input, shape index: {}]   ;;  %s2689_s11 = inlined_call_operand.vmem [shape: f32[1,32], index: 11, kind: input, shape index: {}]   ;;  %s2690_s12 = inlined_call_operand.vmem [shape: f32[1,32], index: 12, kind: input, shape index: {}]   ;;  %s2691_s13 = inlined_call_operand.hbm [shape: f32[16,128], index: 13, kind: output, shape index: {}]  }
   0x1   :  { %v2375_v0 = vld [vmem:[%s2678_s0] sm:$0xff]  ;;  %v2380_v1 = vld [vmem:[%s2678_s0 + $0x8] sm:$0xff] }
   0x2   :  { %18 = vsyncpa [#allocation3], 0  ;;  %v50_v2 = vsel %vm49_vm0, %v2375_v0, 0.0  ;;  %v53_v3 = vsel %vm49_vm0, %v2380_v1, 0.0  ;;  %v93_v14 = vld [vmem:[%s2679_s1] sm:$0xff]  ;;  %v94_v15 = vld [vmem:[%s2679_s1 + $0x8] sm:$0xff] }
   0x3   :  { %51 = vadd.xlane.f32.xlu0 %v50_v2  ;;  %v95_v16 = vld [vmem:[%s2679_s1 + $0x10] sm:$0xff]  ;;  %v2146_v17 = vpack.c.bf16 %v94_v15, %v93_v14  ;;  %v96_v18 = vld [vmem:[%s2679_s1 + $0x18] sm:$0xff]  ;;  %v1892_v27 = vld [vmem:[%s2687_s9] ss:$0 sm:$0xff]  ;;  %v2284_v36 = vmov 0.0   ;;  %vm2285_vm1 = vmmov 0  }
   0x4   :  { %v2150_v19 = vpack.c.bf16 %v96_v18, %v95_v16  ;;  %v1893_v29 = vld [vmem:[%s2688_s10] ss:$0 sm:$0xff]  ;;  %2019 = vmatprep.subr.mxu0 %v2284_v36  ;;  %2021 = vmatprep.mubr.msk.f32.mxu0 %vm2285_vm1, %v2284_v36  ;;  %s2286_s22 = smov 88   ;;  %s2287_s23 = smov 96   ;;  %vm190_vm2 = vcmask 64512   ;;  %vm861_vm3 = vcmask 130048  }
   0x5   :  { %2147 = vmatprep.subr.bf16.mxu1 %v2146_v17  ;;  %v1894_v37 = vld [vmem:[%s2680_s2] ss:$0 sm:$0xff]  ;;  %s2288_s24 = smov 112   ;;  %s2289_s25 = smov 120   ;;  %vm863_vm4 = vcmask 195584  }
   0x6   :  { %2149 = vmatpush3.bf16.msra.mxu1 %v2146_v17  ;;  %s2290_s26 = smov 104   ;;  %s2291_s27 = smov 80  }
   0x7   :  { %54 = vadd.xlane.f32.xlu0 %v53_v3  ;;  %2151 = vmatprep.subr.bf16.mxu1 %v2150_v19  ;;  %s2292_s2 = smov 72   ;;  %s2293_s28 = smov 64  }
   0x8   :  { %s2294_s0 = smov 48   ;;  %s2295_s29 = smov 40  }
   0x9   :  { %s2296_s30 = smov 56   ;;  %s2297_s14 = smov 8  }
   0xa   :  { %2153 = vmatpush3.bf16.msra.mxu1 %v2150_v19  ;;  %s2298_s19 = smov 16   ;;  %s2299_s10 = smov 24  }
   0xb   :  { %2009 = vmatprep.subr.mxu1 %v2284_v36 }
  0x90   :  { %v52_v4 = vpop.xlane.xlu0 %51 }
  0x91   :  { %v57_v5 = vmul.f32 0.03125, %v52_v4 }
  0x93   :  { %v59_v6 = vsub.f32 %v2375_v0, %v57_v5 }
  0x94   :  { %v55_v7 = vpop.xlane.xlu0 %54 }
  0x95   :  { %v58_v8 = vmul.f32 0.03125, %v55_v7  ;;  %v61_v9 = vmul.f32 %v59_v6, %v59_v6 }
  0x97   :  { %v60_v10 = vsub.f32 %v2380_v1, %v58_v8  ;;  %v63_v11 = vsel %vm49_vm0, %v61_v9, 0.0 }
  0x98   :  { %64 = vadd.xlane.f32.xlu1 %v63_v11 }
  0x99   :  { %v62_v12 = vmul.f32 %v60_v10, %v60_v10 }
  0x9b   :  { %v66_v13 = vsel %vm49_vm0, %v62_v12, 0.0 }
  0x9c   :  { %67 = vadd.xlane.f32.xlu1 %v66_v13 }
 0x125   :  { %v65_v20 = vpop.xlane.xlu1 %64 }
 0x126   :  { %v69_v21 = vmul.f32 0.03125, %v65_v20 }
 0x128   :  { %v71_v22 = vadd.f32 1e-05, %v69_v21 }
 0x129   :  { %v68_v23 = vpop.xlane.xlu1 %67 }
 0x12a   :  { %2220 = vrsqrt.f32 %v71_v22  ;;  %v70_v24 = vmul.f32 0.03125, %v68_v23 }
 0x12c   :  { %v72_v25 = vadd.f32 1e-05, %v70_v24 }
 0x12e   :  { %2222 = vrsqrt.f32 %v72_v25 }
 0x134   :  { %v2221_v26 = vpop.eup %2220 }
 0x135   :  { %v75_v28 = vmul.f32 %v2221_v26, %v59_v6 }
 0x137   :  { %v83_v30 = vmul.f32 %v1892_v27, %v75_v28 }
 0x138   :  { %v2223_v31 = vpop.eup %2222 }
 0x139   :  { %v76_v32 = vmul.f32 %v2223_v31, %v60_v10  ;;  %v91_v33 = vadd.f32 %v1893_v29, %v83_v30 }
 0x13b   :  { %v84_v34 = vmul.f32 %v1892_v27, %v76_v32  ;;  %2006 = vmatprep.mubr.msk.f32.mxu1 %vm49_vm0, %v91_v33 }
 0x13d   :  { %v92_v35 = vadd.f32 %v1893_v29, %v84_v34 }
 0x13f   :  { %2007 = vmatmul.mubr.msk.f32.vlgmr.msra.gmra.mrb[0].mxu1 %vm49_vm0, %v92_v35 }
 0x140   :  { %2011 = vmatprep.mubr.msk.f32.mxu1 %vm2285_vm1, %v2284_v36 }
 0x212   :  { %v2008_v38 = vpop.f32.mrb[0].mxu1 }
 0x213   :  { %v176_v39 = vpop.f32.mrb[1].mxu1  ;;  %v2425_v42 = vadd.f32 %v2008_v38, %v1894_v37 }
 0x214   :  { %v2419_v40 = vadd.f32 %v1894_v37, %v176_v39 }
 0x215   :  { %v186_v43 = vmul.f32 0.17677669, %v2425_v42 }
 0x216   :  { %355 = vrot.lane.b32.xlu1 %v2419_v40, %s2286_s22  ;;  %188 = vrot.lane.b32.xlu0 %v2419_v40, %s2287_s23  ;;  %v185_v41 = vmul.f32 0.17677669, %v2419_v40 }
 0x21a   :  { %518 = vrot.lane.b32.xlu0 %v185_v41, %s2288_s24  ;;  %353 = vrot.lane.b32.xlu1 %v185_v41, %s2289_s25 }
 0x21e   :  { %683 = vrot.lane.b32.xlu0 %v185_v41, %s2290_s26  ;;  %520 = vrot.lane.b32.xlu1 %v2419_v40, %s2291_s27 }
 0x222   :  { %1032 = vrot.lane.b32.xlu0 %v2425_v42, %s2286_s22  ;;  %685 = vrot.lane.b32.xlu1 %v2419_v40, %s2292_s2 }
 0x226   :  { %1197 = vrot.lane.b32.xlu0 %v2425_v42, %s2291_s27  ;;  %866 = vrot.lane.b32.xlu1 %v2425_v42, %s2287_s23 }
 0x22a   :  { %1362 = vrot.lane.b32.xlu0 %v2425_v42, %s2292_s2  ;;  %1030 = vrot.lane.b32.xlu1 %v186_v43, %s2289_s25 }
 0x22e   :  { %1195 = vrot.lane.b32.xlu1 %v186_v43, %s2288_s24 }
 0x232   :  { %1360 = vrot.lane.b32.xlu1 %v186_v43, %s2290_s26 }
 0x288   :  { %v356_v44 = vpop.permute.xlu1 %355  ;;  %v189_v45 = vpop.permute.xlu0 %188 }
 0x289   :  { %2010 = vmatpush3.xpose.msk.msra.mxu1 %vm190_vm2, %v189_v45  ;;  %2020 = vmatpush3.xpose.msk.msra.mxu0 %vm190_vm2, %v356_v44 }
 0x28a   :  { %2029 = vmatprep.subr.mxu0 %v2284_v36  ;;  %2014 = vmatprep.subr.mxu1 %v2284_v36 }
 0x28c   :  { %v519_v46 = vpop.permute.xlu0 %518  ;;  %v354_v47 = vpop.permute.xlu1 %353  ;;  %2012 = vmatmul.mubr.msk.f32.vlgmr.msra.gmra.mrb[2].mxu1 %vm190_vm2, %v185_v41 }
 0x28d   :  { %2022 = vmatmul.mubr.msk.f32.vlgmr.msra.gmra.mrb[0].mxu0 %vm190_vm2, %v354_v47  ;;  %2016 = vmatprep.mubr.msk.f32.mxu1 %vm2285_vm1, %v2284_v36 }
 0x28e   :  { %2031 = vmatprep.mubr.msk.f32.mxu0 %vm2285_vm1, %v2284_v36 }
 0x290   :  { %v521_v48 = vpop.permute.xlu1 %520  ;;  %v684_v49 = vpop.permute.xlu0 %683 }
 0x291   :  { %2030 = vmatpush3.xpose.msk.msra.mxu0 %vm190_vm2, %v521_v48 }
 0x292   :  { %2039 = vmatprep.subr.mxu0 %v2284_v36 }
 0x294   :  { %2032 = vmatmul.mubr.msk.f32.vlgmr.msra.gmra.mrb[2].mxu0 %vm190_vm2, %v519_v46  ;;  %v686_v50 = vpop.permute.xlu1 %685  ;;  %v1033_v51 = vpop.permute.xlu0 %1032 }
 0x295   :  { %2040 = vmatpush3.xpose.msk.msra.mxu0 %vm190_vm2, %v686_v50  ;;  %2041 = vmatprep.mubr.msk.f32.mxu0 %vm2285_vm1, %v2284_v36 }
 0x296   :  { %2049 = vmatprep.subr.mxu0 %v2284_v36 }
 0x298   :  { %2042 = vmatmul.mubr.msk.f32.vlgmr.msra.gmra.mrb[4].mxu0 %vm190_vm2, %v684_v49  ;;  %v867_v52 = vpop.permute.xlu1 %866  ;;  %v1198_v54 = vpop.permute.xlu0 %1197 }
 0x299   :  { %2050 = vmatpush3.xpose.msk.msra.mxu0 %vm190_vm2, %v867_v52  ;;  %2051 = vmatprep.mubr.msk.f32.mxu0 %vm2285_vm1, %v2284_v36 }
 0x29a   :  { %2059 = vmatprep.subr.mxu0 %v2284_v36 }
 0x29c   :  { %2052 = vmatmul.mubr.msk.f32.vlgmr.msra.gmra.mrb[6].mxu0 %vm190_vm2, %v186_v43  ;;  %v1031_v53 = vpop.permute.xlu1 %1030  ;;  %v1363_v56 = vpop.permute.xlu0 %1362 }
 0x29d   :  { %2060 = vmatpush3.xpose.msk.msra.mxu0 %vm190_vm2, %v1033_v51  ;;  %2061 = vmatprep.mubr.msk.f32.mxu0 %vm2285_vm1, %v2284_v36 }
 0x29e   :  { %2069 = vmatprep.subr.mxu0 %v2284_v36 }
 0x2a0   :  { %2062 = vmatmul.mubr.msk.f32.vlgmr.msra.gmra.mrb[8].mxu0 %vm190_vm2, %v1031_v53  ;;  %v1196_v55 = vpop.permute.xlu1 %1195 }
 0x2a1   :  { %2070 = vmatpush3.xpose.msk.msra.mxu0 %vm190_vm2, %v1198_v54  ;;  %2071 = vmatprep.mubr.msk.f32.mxu0 %vm2285_vm1, %v2284_v36 }
 0x2a2   :  { %2079 = vmatprep.subr.mxu0 %v2284_v36 }
 0x2a4   :  { %2072 = vmatmul.mubr.msk.f32.vlgmr.msra.gmra.mrb[10].mxu0 %vm190_vm2, %v1196_v55  ;;  %v1361_v57 = vpop.permute.xlu1 %1360 }
 0x2a5   :  { %2080 = vmatpush3.xpose.msk.msra.mxu0 %vm190_vm2, %v1363_v56  ;;  %2081 = vmatprep.mubr.msk.f32.mxu0 %vm2285_vm1, %v2284_v36 }
 0x2a8   :  { %2082 = vmatmul.mubr.msk.f32.vlgmr.msra.gmra.mrb[12].mxu0 %vm190_vm2, %v1361_v57 }
 0x35f   :  { %v262_v58 = vpop.f32.mrb[2].mxu1 }
 0x360   :  { %v2013_v59 = vpop.f32.mrb[3].mxu1  ;;  %v427_v60 = vpop.f32.mrb[0].mxu0  ;;  %v266_v61 = vsel %vm190_vm2, %v262_v58, -inf }
 0x361   :  { %v2023_v62 = vpop.f32.mrb[1].mxu0  ;;  %267 = vmax.xlane.f32.xlu0 %v266_v61  ;;  %v431_v63 = vsel %vm190_vm2, %v427_v60, -inf }
 0x362   :  { %432 = vmax.xlane.f32.xlu1 %v431_v63 }
 0x367   :  { %v592_v2 = vpop.f32.mrb[2].mxu0 }
 0x368   :  { %v2033_v3 = vpop.f32.mrb[3].mxu0  ;;  %v596_v4 = vsel %vm190_vm2, %v592_v2, -inf }
 0x369   :  { %597 = vmax.xlane.f32.xlu0 %v596_v4 }
 0x36b   :  { %v757_v5 = vpop.f32.mrb[4].mxu0 }
 0x36c   :  { %v2043_v6 = vpop.f32.mrb[5].mxu0  ;;  %v761_v7 = vsel %vm190_vm2, %v757_v5, -inf }
 0x36d   :  { %762 = vmax.xlane.f32.xlu0 %v761_v7 }
 0x36f   :  { %v939_v8 = vpop.f32.mrb[6].mxu0 }
 0x370   :  { %v2053_v9 = vpop.f32.mrb[7].mxu0  ;;  %v943_v10 = vsel %vm190_vm2, %v939_v8, -inf }
 0x371   :  { %944 = vmax.xlane.f32.xlu0 %v943_v10 }
 0x373   :  { %v1104_v11 = vpop.f32.mrb[8].mxu0 }
 0x374   :  { %v2063_v12 = vpop.f32.mrb[9].mxu0  ;;  %v1108_v13 = vsel %vm190_vm2, %v1104_v11, -inf }
 0x375   :  { %1109 = vmax.xlane.f32.xlu1 %v1108_v13 }
 0x377   :  { %v1269_v14 = vpop.f32.mrb[10].mxu0 }
 0x378   :  { %v2073_v15 = vpop.f32.mrb[11].mxu0  ;;  %v1273_v16 = vsel %vm190_vm2, %v1269_v14, -inf }
 0x379   :  { %1274 = vmax.xlane.f32.xlu0 %v1273_v16 }
 0x37b   :  { %v2477_v17 = vpop.f32.mrb[12].mxu0 }
 0x37c   :  { %v2083_v18 = vpop.f32.mrb[13].mxu0  ;;  %v1438_v19 = vsel %vm190_vm2, %v2477_v17, -inf }
 0x386   :  { %277 = vrot.lane.b32.xlu1 %v2419_v40, %s2293_s28 }
 0x3aa   :  { %1439 = vmax.xlane.f32.xlu1 %v1438_v19 }
 0x3bb   :  { %607 = vrot.lane.b32.xlu1 %v2419_v40, %s2294_s0 }
 0x3bf   :  { %772 = vrot.lane.b32.xlu1 %v2419_v40, %s2295_s29 }
 0x3c3   :  { %954 = vrot.lane.b32.xlu1 %v2425_v42, %s2293_s28 }
 0x3ee   :  { %v268_v20 = vpop.xlane.xlu0 %267 }
 0x3ef   :  { %v269_v21 = vsub.f32 %v262_v58, %v268_v20  ;;  %v433_v22 = vpop.xlane.xlu1 %432 }
 0x3f0   :  { %v434_v23 = vsub.f32 %v427_v60, %v433_v22 }
 0x3f1   :  { %v270_v24 = vmul.f32 1.442695, %v269_v21 }
 0x3f2   :  { %v435_v25 = vmul.f32 1.442695, %v434_v23 }
 0x3f3   :  { %2224 = vpow2.f32 %v270_v24 }
 0x3f4   :  { %2226 = vpow2.f32 %v435_v25 }
 0x3f6   :  { %v598_v26 = vpop.xlane.xlu0 %597 }
 0x3f7   :  { %v599_v39 = vsub.f32 %v592_v2, %v598_v26 }
 0x3f9   :  { %v600_v43 = vmul.f32 1.442695, %v599_v39 }
 0x3fa   :  { %v763_v27 = vpop.xlane.xlu0 %762 }
 0x3fb   :  { %v764_v28 = vsub.f32 %v757_v5, %v763_v27 }
 0x3fd   :  { %v2225_v29 = vpop.eup %2224  ;;  %v765_v30 = vmul.f32 1.442695, %v764_v28 }
 0x3fe   :  { %v2487_v31 = vpop.eup %2226  ;;  %v272_v32 = vsel %vm190_vm2, %v2225_v29, 0.0  ;;  %v945_v41 = vpop.xlane.xlu0 %944 }
 0x3ff   :  { %2228 = vpow2.f32 %v765_v30  ;;  %273 = vadd.xlane.f32.xlu0 %v272_v32  ;;  %v437_v33 = vsel %vm190_vm2, %v2487_v31, 0.0  ;;  %v946_v44 = vsub.f32 %v939_v8, %v945_v41  ;;  %v1542_v41 = vld [vmem:[%s2681_s3 + $0x10] sm:$0xff] }
 0x400   :  { %438 = vadd.xlane.f32.xlu1 %v437_v33  ;;  %2230 = vpow2.f32 %v600_v43  ;;  %v1543_v43 = vld [vmem:[%s2681_s3 + $0x18] sm:$0xff] }
 0x401   :  { %v947_v46 = vmul.f32 1.442695, %v946_v44 }
 0x402   :  { %v1110_v34 = vpop.xlane.xlu1 %1109 }
 0x403   :  { %2232 = vpow2.f32 %v947_v46  ;;  %v1111_v48 = vsub.f32 %v1104_v11, %v1110_v34 }
 0x405   :  { %v1112_v50 = vmul.f32 1.442695, %v1111_v48 }
 0x406   :  { %v278_v35 = vpop.permute.xlu1 %277  ;;  %v1275_v45 = vpop.xlane.xlu0 %1274 }
 0x407   :  { %2015 = vmatpush3.msra.mxu1 %v278_v35  ;;  %v1276_v47 = vsub.f32 %v1269_v14, %v1275_v45  ;;  %v1540_v35 = vld [vmem:[%s2681_s3] sm:$0xff]  ;;  %v2158_v45 = vpack.c.bf16 %v1543_v43, %v1542_v41  ;;  %v1782_v43 = vld [vmem:[%s2685_s7 + $0x50] sm:$0xff] }
 0x408   :  { %2024 = vmatprep.subr.mxu1 %v2284_v36 }
 0x409   :  { %v2493_v37 = vpop.eup %2228  ;;  %v1277_v49 = vmul.f32 1.442695, %v1276_v47 }
 0x40a   :  { %v767_v38 = vsel %vm190_vm2, %v2493_v37, 0.0  ;;  %v2231_v51 = vpop.eup %2230 }
 0x40b   :  { %768 = vadd.xlane.f32.xlu1 %v767_v38  ;;  %2234 = vpow2.f32 %v1277_v49  ;;  %v602_v52 = vsel %vm190_vm2, %v2231_v51, 0.0 }
 0x40c   :  { %2236 = vpow2.f32 %v1112_v50 }
 0x415   :  { %442 = vrot.lane.b32.xlu0 %v2419_v40, %s2296_s30  ;;  %v2233_v40 = vpop.eup %2232 }
 0x416   :  { %v949_v54 = vsel %vm190_vm2, %v2233_v40, 0.0  ;;  %v2501_v55 = vpop.eup %2234 }
 0x417   :  { %v1279_v58 = vsel %vm190_vm2, %v2501_v55, 0.0  ;;  %v2237_v59 = vpop.eup %2236 }
 0x418   :  { %v1114_v60 = vsel %vm190_vm2, %v2237_v59, 0.0 }
 0x41c   :  { %1119 = vrot.lane.b32.xlu1 %v2425_v42, %s2296_s30 }
 0x434   :  { %603 = vadd.xlane.f32.xlu0 %v602_v52 }
 0x437   :  { %v1440_v53 = vpop.xlane.xlu1 %1439 }
 0x438   :  { %v1441_v56 = vsub.f32 %v2477_v17, %v1440_v53  ;;  %950 = vadd.xlane.f32.xlu0 %v949_v54 }
 0x43a   :  { %v1442_v57 = vmul.f32 1.442695, %v1441_v56 }
 0x43b   :  { %v608_v63 = vpop.permute.xlu1 %607 }
 0x43c   :  { %2238 = vpow2.f32 %v1442_v57  ;;  %1280 = vadd.xlane.f32.xlu0 %v1279_v58 }
 0x43f   :  { %v773_v2 = vpop.permute.xlu1 %772 }
 0x440   :  { %1115 = vadd.xlane.f32.xlu1 %v1114_v60 }
 0x443   :  { %v955_v3 = vpop.permute.xlu1 %954 }
 0x446   :  { %v2507_v61 = vpop.eup %2238 }
 0x447   :  { %v1444_v62 = vsel %vm190_vm2, %v2507_v61, 0.0 }
 0x448   :  { %1445 = vadd.xlane.f32.xlu0 %v1444_v62 }
 0x451   :  { %1449 = vrot.lane.b32.xlu1 %v2425_v42, %s2295_s29 }
 0x45e   :  { %1284 = vrot.lane.b32.xlu0 %v2425_v42, %s2294_s0 }
 0x48c   :  { %v274_v4 = vpop.xlane.xlu0 %273 }
 0x48d   :  { %2240 = vrcp.f32 %v274_v4  ;;  %v439_v5 = vpop.xlane.xlu1 %438  ;;  %v1921_v4 = vld [vmem:[%s2682_s4] ss:$0 sm:$0xff] }
 0x48e   :  { %2242 = vrcp.f32 %v439_v5 }
 0x490   :  { %v443_v9 = vpop.permute.xlu0 %442 }
 0x497   :  { %v2241_v6 = vpop.eup %2240 }
 0x498   :  { %v276_v7 = vmul.f32 %v2241_v6, %v2225_v29  ;;  %v2243_v8 = vpop.eup %2242  ;;  %v769_v42 = vpop.xlane.xlu1 %768 }
 0x499   :  { %v441_v10 = vmul.f32 %v2243_v8, %v2487_v31 }
 0x49a   :  { %2017 = vmatmul.mubr.msk.f32.vlgmr.msra.gmra.mrb[4].mxu1 %vm190_vm2, %v276_v7 }
 0x49b   :  { %2025 = vmatpush3.msra.mxu1 %v443_v9  ;;  %2026 = vmatprep.mubr.msk.f32.mxu1 %vm2285_vm1, %v2284_v36 }
 0x49c   :  { %2034 = vmatprep.subr.mxu1 %v2284_v36  ;;  %v1120_v13 = vpop.permute.xlu1 %1119 }
 0x49e   :  { %2027 = vmatmul.mubr.msk.f32.vlgmr.msra.gmra.mrb[6].mxu1 %vm190_vm2, %v441_v10 }
 0x49f   :  { %2035 = vmatpush3.msra.mxu1 %v608_v63  ;;  %2036 = vmatprep.mubr.msk.f32.mxu1 %vm2285_vm1, %v2284_v36 }
 0x4a0   :  { %2044 = vmatprep.subr.mxu1 %v2284_v36 }
 0x4c1   :  { %v604_v11 = vpop.xlane.xlu0 %603 }
 0x4c2   :  { %2244 = vrcp.f32 %v604_v11 }
 0x4c3   :  { %2246 = vrcp.f32 %v769_v42 }
 0x4c5   :  { %v951_v12 = vpop.xlane.xlu0 %950 }
 0x4c6   :  { %2248 = vrcp.f32 %v951_v12 }
 0x4c9   :  { %v1281_v16 = vpop.xlane.xlu0 %1280 }
 0x4cc   :  { %v2245_v14 = vpop.eup %2244 }
 0x4cd   :  { %v606_v15 = vmul.f32 %v2245_v14, %v2231_v51  ;;  %v1116_v17 = vpop.xlane.xlu1 %1115  ;;  %v2247_v18 = vpop.eup %2246 }
 0x4ce   :  { %2250 = vrcp.f32 %v1116_v17  ;;  %v771_v19 = vmul.f32 %v2247_v18, %v2493_v37  ;;  %v1541_v37 = vld [vmem:[%s2681_s3 + $0x8] sm:$0xff] }
 0x4cf   :  { %2037 = vmatmul.mubr.msk.f32.vlgmr.msra.gmra.mrb[8].mxu1 %vm190_vm2, %v606_v15  ;;  %2252 = vrcp.f32 %v1281_v16  ;;  %v2154_v38 = vpack.c.bf16 %v1541_v37, %v1540_v35  ;;  %v1778_v35 = vld [vmem:[%s2685_s7 + $0x30] sm:$0xff]  ;;  %v1779_v37 = vld [vmem:[%s2685_s7 + $0x38] sm:$0xff] }
 0x4d0   :  { %2045 = vmatpush3.msra.mxu1 %v773_v2  ;;  %2046 = vmatprep.mubr.msk.f32.mxu1 %vm2285_vm1, %v2284_v36  ;;  %v2249_v20 = vpop.eup %2248 }
 0x4d1   :  { %2054 = vmatprep.subr.mxu1 %v2284_v36  ;;  %v953_v21 = vmul.f32 %v2249_v20, %v2233_v40  ;;  %v1450_v28 = vpop.permute.xlu1 %1449  ;;  %v1678_v20 = vld [vmem:[%s2683_s5] sm:$0xff] }
 0x4d3   :  { %2047 = vmatmul.mubr.msk.f32.vlgmr.msra.gmra.mrb[10].mxu1 %vm190_vm2, %v771_v19 }
 0x4d4   :  { %2055 = vmatpush3.msra.mxu1 %v955_v3  ;;  %2056 = vmatprep.mubr.msk.f32.mxu1 %vm2285_vm1, %v2284_v36 }
 0x4d5   :  { %v1446_v22 = vpop.xlane.xlu0 %1445  ;;  %2064 = vmatprep.subr.mxu1 %v2284_v36 }
 0x4d6   :  { %2254 = vrcp.f32 %v1446_v22 }
 0x4d7   :  { %2057 = vmatmul.mubr.msk.f32.vlgmr.msra.gmra.mrb[12].mxu1 %vm190_vm2, %v953_v21  ;;  %v1679_v21 = vld [vmem:[%s2683_s5 + $0x8] sm:$0xff] }
 0x4d8   :  { %v2251_v23 = vpop.eup %2250  ;;  %2065 = vmatpush3.msra.mxu1 %v1120_v13  ;;  %2066 = vmatprep.mubr.msk.f32.mxu1 %vm2285_vm1, %v2284_v36  ;;  %v2162_v22 = vpack.c.bf16 %v1679_v21, %v1678_v20 }
 0x4d9   :  { %v1118_v24 = vmul.f32 %v2251_v23, %v2237_v59  ;;  %v1285_v25 = vpop.permute.xlu0 %1284  ;;  %2074 = vmatprep.subr.mxu1 %v2284_v36  ;;  %v2253_v26 = vpop.eup %2252  ;;  %v1680_v23 = vld [vmem:[%s2683_s5 + $0x10] sm:$0xff] }
 0x4da   :  { %v1283_v27 = vmul.f32 %v2253_v26, %v2501_v55  ;;  %v1772_v26 = vld [vmem:[%s2685_s7] sm:$0xff] }
 0x4db   :  { %2067 = vmatmul.mubr.msk.f32.vlgmr.msra.gmra.mrb[14].mxu1 %vm190_vm2, %v1118_v24  ;;  %v1681_v24 = vld [vmem:[%s2683_s5 + $0x18] sm:$0xff] }
 0x4dc   :  { %2075 = vmatpush3.msra.mxu1 %v1285_v25  ;;  %2076 = vmatprep.mubr.msk.f32.mxu1 %vm2285_vm1, %v2284_v36  ;;  %v2166_v25 = vpack.c.bf16 %v1681_v24, %v1680_v23 }
 0x4dd   :  { %2084 = vmatprep.subr.mxu1 %v2284_v36 }
 0x4df   :  { %2077 = vmatmul.mubr.msk.f32.vlgmr.msra.gmra.mrb[16].mxu1 %vm190_vm2, %v1283_v27  ;;  %v1773_v27 = vld [vmem:[%s2685_s7 + $0x8] sm:$0xff] }
 0x4e0   :  { %v2255_v29 = vpop.eup %2254  ;;  %2085 = vmatpush3.msra.mxu1 %v1450_v28  ;;  %2086 = vmatprep.mubr.msk.f32.mxu1 %vm2285_vm1, %v2284_v36  ;;  %v1774_v28 = vld [vmem:[%s2685_s7 + $0x10] sm:$0xff] }
 0x4e1   :  { %v1448_v30 = vmul.f32 %v2255_v29, %v2507_v61  ;;  %2155 = vmatprep.subr.bf16.mxu1 %v2154_v38  ;;  %v2170_v29 = vpack.c.bf16 %v1773_v27, %v1772_v26 }
 0x4e3   :  { %2087 = vmatmul.mubr.msk.f32.vlgmr.msra.gmra.mrb[18].mxu1 %vm190_vm2, %v1448_v30  ;;  %v1775_v30 = vld [vmem:[%s2685_s7 + $0x18] sm:$0xff]  ;;  %2171 = vmatprep.subr.bf16.mxu0 %v2170_v29 }
 0x4e4   :  { %2157 = vmatpush3.bf16.msra.mxu1 %v2154_v38  ;;  %2173 = vmatpush3.bf16.msra.mxu0 %v2170_v29  ;;  %v1780_v38 = vld [vmem:[%s2685_s7 + $0x40] sm:$0xff] }
 0x4e5   :  { %2159 = vmatprep.subr.bf16.mxu1 %v2158_v45 }
 0x4e8   :  { %2161 = vmatpush3.bf16.msra.mxu1 %v2158_v45 }
 0x4e9   :  { %2163 = vmatprep.subr.bf16.mxu1 %v2162_v22 }
 0x56d   :  { %v349_v31 = vpop.f32.mrb[4].mxu1 }
 0x56e   :  { %v2018_v32 = vpop.f32.mrb[5].mxu1 }
 0x56f   :  { %v1776_v32 = vld [vmem:[%s2685_s7 + $0x20] sm:$0xff] }
 0x571   :  { %v514_v33 = vpop.f32.mrb[6].mxu1 }
 0x572   :  { %849 = vrot.lane.b32.xlu0 %v514_v33, %s2297_s14  ;;  %v2028_v34 = vpop.f32.mrb[7].mxu1  ;;  %v1777_v33 = vld [vmem:[%s2685_s7 + $0x28] sm:$0xff] }
 0x573   :  { %v2178_v34 = vpack.c.bf16 %v1777_v33, %v1776_v32 }
 0x5a2   :  { %v679_v36 = vpop.f32.mrb[8].mxu1 }
 0x5a3   :  { %853 = vrot.lane.b32.xlu1 %v679_v36, %s2298_s19  ;;  %v2038_v39 = vpop.f32.mrb[9].mxu1  ;;  %v2182_v36 = vpack.c.bf16 %v1779_v37, %v1778_v35 }
 0x5a4   :  { %v1781_v39 = vld [vmem:[%s2685_s7 + $0x48] sm:$0xff] }
 0x5a5   :  { %v2186_v41 = vpack.c.bf16 %v1781_v39, %v1780_v38 }
 0x5a6   :  { %v844_v44 = vpop.f32.mrb[10].mxu1 }
 0x5a7   :  { %857 = vrot.lane.b32.xlu1 %v844_v44, %s2299_s10  ;;  %v2048_v46 = vpop.f32.mrb[11].mxu1  ;;  %v1783_v44 = vld [vmem:[%s2685_s7 + $0x58] sm:$0xff] }
 0x5a8   :  { %v2190_v45 = vpack.c.bf16 %v1783_v44, %v1782_v43  ;;  %v1784_v46 = vld [vmem:[%s2685_s7 + $0x60] sm:$0xff] }
 0x5aa   :  { %v1026_v47 = vpop.f32.mrb[12].mxu1 }
 0x5ab   :  { %v2058_v48 = vpop.f32.mrb[13].mxu1 }
 0x5ae   :  { %v1191_v49 = vpop.f32.mrb[14].mxu1 }
 0x5af   :  { %1526 = vrot.lane.b32.xlu0 %v1191_v49, %s2297_s14  ;;  %v2068_v50 = vpop.f32.mrb[15].mxu1 }
 0x5b2   :  { %v1356_v51 = vpop.f32.mrb[16].mxu1 }
 0x5b3   :  { %1530 = vrot.lane.b32.xlu0 %v1356_v51, %s2298_s19  ;;  %v2078_v52 = vpop.f32.mrb[17].mxu1 }
 0x5b6   :  { %v1521_v40 = vpop.f32.mrb[18].mxu1 }
 0x5b7   :  { %1534 = vrot.lane.b32.xlu1 %v1521_v40, %s2299_s10  ;;  %v2088_v53 = vpop.f32.mrb[19].mxu1 }
 0x5e4   :  { %v850_v54 = vpop.permute.xlu0 %849 }
 0x5e5   :  { %v860_v56 = vsel %vm190_vm2, %v349_v31, %v850_v54  ;;  %v2174_v31 = vpack.c.bf16 %v1775_v30, %v1774_v28 }
 0x5e7   :  { %2175 = vmatprep.subr.bf16.mxu0 %v2174_v31 }
 0x5e8   :  { %2177 = vmatpush3.bf16.msra.mxu0 %v2174_v31 }
 0x5e9   :  { %2179 = vmatprep.subr.bf16.mxu0 %v2178_v34 }
 0x5ec   :  { %2181 = vmatpush3.bf16.msra.mxu0 %v2178_v34 }
 0x5ed   :  { %2183 = vmatprep.subr.bf16.mxu0 %v2182_v36 }
 0x5f0   :  { %2185 = vmatpush3.bf16.msra.mxu0 %v2182_v36 }
 0x5f1   :  { %2187 = vmatprep.subr.bf16.mxu0 %v2186_v41 }
 0x5f4   :  { %2189 = vmatpush3.bf16.msra.mxu0 %v2186_v41 }
 0x5f5   :  { %2191 = vmatprep.subr.bf16.mxu0 %v2190_v45 }
 0x5f8   :  { %2193 = vmatpush3.bf16.msra.mxu0 %v2190_v45 }
 0x615   :  { %v854_v55 = vpop.permute.xlu1 %853 }
 0x616   :  { %v862_v57 = vsel %vm861_vm3, %v860_v56, %v854_v55  ;;  %v1924_v55 = vld [vmem:[%s2689_s11] ss:$0 sm:$0xff] }
 0x619   :  { %v858_v58 = vpop.permute.xlu1 %857 }
 0x61a   :  { %v864_v59 = vsel %vm863_vm4, %v862_v57, %v858_v58  ;;  %v1925_v57 = vld [vmem:[%s2690_s12] ss:$0 sm:$0xff] }
 0x61b   :  { %2097 = vmatprep.mubr.msk.f32.mxu1 %vm49_vm0, %v864_v59 }
 0x621   :  { %v1527_v60 = vpop.permute.xlu0 %1526 }
 0x622   :  { %v1537_v62 = vsel %vm190_vm2, %v1026_v47, %v1527_v60  ;;  %v1785_v47 = vld [vmem:[%s2685_s7 + $0x68] sm:$0xff] }
 0x623   :  { %v2194_v48 = vpack.c.bf16 %v1785_v47, %v1784_v46 }
 0x625   :  { %v1531_v61 = vpop.permute.xlu0 %1530  ;;  %2195 = vmatprep.subr.bf16.mxu0 %v2194_v48 }
 0x626   :  { %v1538_v63 = vsel %vm861_vm3, %v1537_v62, %v1531_v61  ;;  %2197 = vmatpush3.bf16.msra.mxu0 %v2194_v48 }
 0x629   :  { %v1535_v2 = vpop.permute.xlu1 %1534 }
 0x62a   :  { %v1539_v3 = vsel %vm863_vm4, %v1538_v63, %v1535_v2  ;;  %v1786_v2 = vld [vmem:[%s2685_s7 + $0x70] sm:$0xff] }
 0x62b   :  { %2098 = vmatmul.mubr.msk.f32.vlgmr.msra.gmra.mrb[20].mxu1 %vm49_vm0, %v1539_v3  ;;  %v1787_v3 = vld [vmem:[%s2685_s7 + $0x78] sm:$0xff]  ;;  %s2300_s7 = smov [#allocation2]  }
 0x62c   :  { %2165 = vmatpush3.bf16.msra.mxu1 %v2162_v22  ;;  %s1881_s3 = sshll.u32 %s2300_s7, 4  ;;  %s1882_s3 = int_to_ptr.vmem [resolvable:$true] %s1881_s3 }
 0x62d   :  { %2167 = vmatprep.subr.bf16.mxu1 %v2166_v25  ;;  %p2265_p1 = scmp.lt.s32.totalorder %s1882_s3, %s1882_s3 }
 0x630   :  { %2169 = vmatpush3.bf16.msra.mxu1 %v2166_v25 }
 0x6fe   :  { %v2099_v5 = vpop.f32.mrb[20].mxu1 }
 0x6ff   :  { %v1629_v6 = vadd.f32 %v2099_v5, %v1921_v4  ;;  %v1623_v7 = vpop.f32.mrb[21].mxu1  ;;  %v1926_v5 = vld [vmem:[%s2684_s6] ss:$0 sm:$0xff]  ;;  %s2260_s6 = scalar_lea.vmem %s1882_s3, 256 }
 0x700   :  { %v1624_v8 = vadd.f32 %v1921_v4, %v1623_v7  ;;  %v2198_v4 = vpack.c.bf16 %v1787_v3, %v1786_v2  ;;  %p2261_p0 = scmp.ne.s32.totalorder %s1882_s3, %s2260_s6  ;;  %p2266_p2 = scmp.lt.s32.totalorder %s2260_s6, %s2260_s6 }
 0x701   :  { %v2569_v9 = vadd.f32 %v1629_v6, %v2380_v1 }
 0x702   :  { %v2572_v10 = vadd.f32 %v1624_v8, %v2375_v0  ;;  %2199 = vmatprep.subr.bf16.mxu0 %v2198_v4  ;;  %p2267_p3 = por %p2266_p2, %p2265_p1 }
 0x703   :  { %v1639_v42 = vsel %vm49_vm0, %v2569_v9, 0.0  ;;  %2201 = vmatpush3.bf16.msra.mxu0 %v2198_v4 }
 0x704   :  { %1640 = vadd.xlane.f32.xlu1 %v1639_v42  ;;  %v1636_v11 = vsel %vm49_vm0, %v2572_v10, 0.0  ;;  %p2268_p4 = pnand %p2267_p3, %p2261_p0 }
 0x705   :  { %1637 = vadd.xlane.f32.xlu0 %v1636_v11 }
 0x791   :  { %v1641_v12 = vpop.xlane.xlu1 %1640 }
 0x792   :  { %v1643_v13 = vmul.f32 0.03125, %v1641_v12  ;;  %v1638_v14 = vpop.xlane.xlu0 %1637 }
 0x793   :  { %v1642_v15 = vmul.f32 0.03125, %v1638_v14 }
 0x794   :  { %v2579_v16 = vsub.f32 %v2569_v9, %v1643_v13  ;;  %v1929_v13 = vld [vmem:[%s2686_s8] ss:$0 sm:$0xff] }
 0x795   :  { %v1644_v1 = vsub.f32 %v2572_v10, %v1642_v15 }
 0x796   :  { %v1647_v18 = vmul.f32 %v2579_v16, %v2579_v16 }
 0x797   :  { %v1646_v17 = vmul.f32 %v1644_v1, %v1644_v1 }
 0x798   :  { %v1651_v19 = vsel %vm49_vm0, %v1647_v18, 0.0 }
 0x799   :  { %v1648_v0 = vsel %vm49_vm0, %v1646_v17, 0.0 }
 0x79a   :  { %1649 = vadd.xlane.f32.xlu0 %v1648_v0 }
 0x79e   :  { %1652 = vadd.xlane.f32.xlu0 %v1651_v19 }
 0x827   :  { %v1650_v49 = vpop.xlane.xlu0 %1649 }
 0x828   :  { %v1654_v50 = vmul.f32 0.03125, %v1650_v49 }
 0x82a   :  { %v1656_v51 = vadd.f32 1e-05, %v1654_v50 }
 0x82b   :  { %v1653_v52 = vpop.xlane.xlu0 %1652 }
 0x82c   :  { %2256 = vrsqrt.f32 %v1656_v51  ;;  %v1655_v40 = vmul.f32 0.03125, %v1653_v52 }
 0x82e   :  { %v1657_v53 = vadd.f32 1e-05, %v1655_v40 }
 0x830   :  { %2258 = vrsqrt.f32 %v1657_v53 }
 0x836   :  { %v2257_v54 = vpop.eup %2256 }
 0x837   :  { %v1660_v56 = vmul.f32 %v2257_v54, %v1644_v1 }
 0x839   :  { %v1668_v58 = vmul.f32 %v1924_v55, %v1660_v56 }
 0x83a   :  { %v2259_v59 = vpop.eup %2258 }
 0x83b   :  { %v1661_v60 = vmul.f32 %v2259_v59, %v2579_v16  ;;  %v1676_v61 = vadd.f32 %v1925_v57, %v1668_v58 }
 0x83d   :  { %v1669_v62 = vmul.f32 %v1924_v55, %v1661_v60  ;;  %2108 = vmatprep.mubr.msk.f32.mxu1 %vm49_vm0, %v1676_v61 }
 0x83f   :  { %v1677_v63 = vadd.f32 %v1925_v57, %v1669_v62 }
 0x841   :  { %2109 = vmatmul.mubr.msk.f32.vlgmr.msra.gmra.mrb[22].mxu1 %vm49_vm0, %v1677_v63 }
 0x914   :  { %v2110_v6 = vpop.f32.mrb[22].mxu1 }
 0x915   :  { %v1767_v7 = vadd.f32 %v2110_v6, %v1926_v5  ;;  %v1761_v8 = vpop.f32.mrb[23].mxu1 }
 0x916   :  { %v1762_v42 = vadd.f32 %v1926_v5, %v1761_v8 }
 0x917   :  { %v1771_v12 = vmax.f32 %v1767_v7, 0.0 }
 0x918   :  { %v1770_v11 = vmax.f32 %v1762_v42, 0.0 }
 0x91a   :  { %2143 = vmatprep.mubr.f32.mxu0 %v1770_v11 }
 0x91b   :  { %2144 = vmatmul.mubr.f32.vlgmr.msra.gmra.mrb[14].mxu0 %v1771_v12 }
 0x9ee   :  { %v2145_v14 = vpop.f32.mrb[14].mxu0 }
 0x9ef   :  { %v1867_v15 = vadd.f32 %v2145_v14, %v1929_v13  ;;  %v1861_v16 = vpop.f32.mrb[15].mxu0 }
 0x9f0   :  { %v1862_v1 = vadd.f32 %v1929_v13, %v1861_v16 }
 0x9f1   :  { %v1871_v17 = vadd.f32 %v1867_v15, %v2569_v9 }
 0x9f2   :  { %v1870_v0 = vadd.f32 %v1862_v1, %v2572_v10 }
 0x9f3   :  { %v1873_v18 = vsel %vm49_vm0, %v1871_v17, 0.0 }
 0x9f4   :  { %1875 = vst [vmem:[#allocation2 + $0x8] sm:$0xff] %v1873_v18  ;;  %v1872_v19 = vsel %vm49_vm0, %v1870_v0, 0.0 }
 0x9f5   :  { %1874 = vst [vmem:[#allocation2] sm:$0xff] %v1872_v19 }
 0x9f6   :  { %2271 = shalt.err (!%p2268_p4)
}
 0x9f7   :  { %s2272_s4 = scalar_lea.hbm %s2691_s13, 256 }
 0x9f8   :  { %p2273_p5 = scmp.ne.s32.totalorder %s2691_s13, %s2272_s4  ;;  %p2276_p6 = scmp.lt.u32.totalorder %s2272_s4, %s2691_s13 }
 0x9fa   :  { %p2278_p7 = pnand %p2276_p6, %p2273_p5 }
 0x9fc   :  { %2281 = shalt.err (!%p2278_p7)
}
 0x9fd   :  { %s2301_s27 = smov 128  }
 0x9fe   :  { %1887 = dma.vmem_to_hbm [thread:$0]  %s1882_s3, 256, %s2691_s13, [#allocation3], %s2301_s27, %s2301_s27, %s2297_s14  }
 0x9ff   :  { %2282 = dma.done.wait [#allocation3], 256  }
 0xa00   :  { %2283 = vsyncadd [#allocation3], 4294967040 }
 0xa01   :  { %1891 = vsyncpa [#allocation3], 1 }

</bundles_post_ra>
